<compile_context>
chip_gen: v5e
topology: v5e:2x2
jax: 0.10.0
libtpu: 0.0.40
codegen_flags: <defaults>
</compile_context>

<pallas_src>
import jax
import jax.numpy as jnp
from jax.experimental import pallas as pl
from jax.experimental.pallas import tpu as pltpu


# ----------------------------------------------------------------------------
# Kernel: per-variable (folded embed+head) linear over a batch tile
# ----------------------------------------------------------------------------
def _head_kernel(p_ref, w_ref, b_ref, o_ref):
    """One (variable, batch-tile) grid step.

    p_ref : (b_tile, P, L)  patched rows of one variable
    w_ref : (L, L)          folded (embed @ head) weight for this variable
    b_ref : (1, L)          folded bias for this variable
    o_ref : (b_tile, P, L)  head output tile
    """
    bt, P, L = p_ref.shape
    w = w_ref[...]
    b = b_ref[...]
    if P % 8 == 0:
        # Merged matmul: leading-dim collapse (bt, P, L) -> (bt*P, L) keeps the
        # lane dim L unchanged and is sublane-tile aligned (P % 8 == 0), so it
        # is layout-free. One matmul with M = bt*P, one whole-block store.
        x2d = p_ref[...].reshape(bt * P, L)
        y2d = jnp.dot(x2d, w, preferred_element_type=jnp.float32) + b
        o_ref[...] = y2d.reshape(bt, P, L).astype(o_ref.dtype)
    else:
        # Short static loop over the P patches (never over batch): each matmul
        # still has a large M = b_tile; weight / bias are hoisted above.
        for p in range(P):
            y = jnp.dot(p_ref[:, p, :], w, preferred_element_type=jnp.float32) + b
            o_ref[:, p, :] = y.astype(o_ref.dtype)


def _vmem_capacity_bytes():
    try:
        return int(pltpu.get_tpu_info().vmem_capacity_bytes)
    except Exception:
        return 64 << 20  # conservative fallback: v7x per-TensorCore VMEM


def fused_head(patched, w_eff, b_eff, *, b_tile=None, out_dtype=None):
    """out[b, v] = patched[b, v] @ w_eff[v] + b_eff[v]

    patched: (B, V, P, L)   w_eff: (V, L, L)   b_eff: (V, L)
    returns  (B, V, P, L)
    """
    B, V, P, L = patched.shape
    assert w_eff.shape == (V, L, L) and b_eff.shape == (V, L)
    out_dtype = out_dtype or patched.dtype

    elt = jnp.dtype(patched.dtype).itemsize
    welt = jnp.dtype(w_eff.dtype).itemsize
    row_bytes = P * L * elt                  # one batch element of one variable
    w_bytes = 2 * (L * L + L) * welt         # per-variable weight+bias, double-buffered
    slack = 2 << 20

    # Per-generation VMEM budget: <= half of physical VMEM (32 MiB on
    # v5e/v6e's 128 MiB, 32 MiB on v7x's 64 MiB) so surrounding XLA scoped
    # VMEM still has headroom.
    budget = min(_vmem_capacity_bytes() // 2, 32 << 20)

    if b_tile is None:
        # 2x double-buffered input blocks + 2x output blocks per grid step.
        b_tile = max((budget - w_bytes - slack) // (4 * row_bytes), 1)
    b_tile = int(min(b_tile, B))

    # MXU-friendly: make M = b_tile*P a multiple of 256 when the tile is big
    # enough (128 would suffice on v5e; 256 also covers v6e/v7x).
    m_align = 256
    if b_tile < B and m_align % P == 0:
        step = m_align // P
        if b_tile >= step:
            b_tile = (b_tile // step) * step

    # Keep >= 2 grid steps so both v7x TensorCores get work.
    if V * pl.cdiv(B, b_tile) < 2 and B > 1:
        b_tile = pl.cdiv(B, 2)

    # Pad the batch to a multiple of b_tile (no divisor search / tail tiles).
    n_btiles = pl.cdiv(B, b_tile)
    B_pad = n_btiles * b_tile
    if B_pad != B:
        patched = jnp.pad(patched, ((0, B_pad - B), (0, 0), (0, 0), (0, 0)))

    io_block = b_tile * row_bytes
    need = 4 * io_block + w_bytes + slack
    vmem_limit = int(min(max(need, 8 << 20), budget))
    vmem_limit = int(max(vmem_limit, need))  # never clamp below the footprint

    flops = 2 * B_pad * V * P * L * L
    bytes_accessed = 2 * B_pad * V * P * L * elt + V * (L * L + L) * welt

    out = pl.pallas_call(
        _head_kernel,
        out_shape=jax.ShapeDtypeStruct((B_pad, V, P, L), out_dtype),
        grid=(V, n_btiles),  # V outer; the per-variable weight block index is
                             # constant along the inner (batch) axis, so it is
                             # only fetched once per variable.
        in_specs=[
            # (B, V, P, L): squeeze the variable axis, tile the batch axis.
            pl.BlockSpec((b_tile, None, P, L), lambda v, b: (b, v, 0, 0)),
            pl.BlockSpec((None, L, L), lambda v, b: (v, 0, 0)),  # per-var weight
            pl.BlockSpec((None, 1, L), lambda v, b: (v, 0, 0)),  # per-var bias
        ],
        out_specs=pl.BlockSpec((b_tile, None, P, L), lambda v, b: (b, v, 0, 0)),
        compiler_params=pltpu.CompilerParams(
            dimension_semantics=("parallel", "parallel"),
            vmem_limit_bytes=vmem_limit,
        ),
        cost_estimate=pl.CostEstimate(
            flops=int(flops), transcendentals=0,
            bytes_accessed=int(bytes_accessed)),
    )(patched, w_eff, b_eff.reshape(V, 1, L))

    return out[:B] if B_pad != B else out


# ----------------------------------------------------------------------------
# Model wrapper
# ----------------------------------------------------------------------------
def init_params(key, in_dim, patch_len, d_model):
    k1, k2, k3, k4 = jax.random.split(key, 4)
    # stand-in encoder patch embedding (shared across variables)
    w_emb = jax.random.normal(k1, (patch_len, d_model), jnp.float32) * 0.02
    b_emb = jax.random.normal(k2, (d_model,), jnp.float32) * 0.02
    # Head: one Linear(d_model, patch_len) per variable
    w_head = jax.random.normal(k3, (in_dim, d_model, patch_len), jnp.float32) * 0.02
    b_head = jax.random.normal(k4, (in_dim, patch_len), jnp.float32) * 0.02
    return dict(w_emb=w_emb, b_emb=b_emb, w_head=w_head, b_head=b_head)


def jepatchtrad_forward(params, x, patch_len):
    """x: (B, ws, in_dim) -> (patched, out), both (B, in_dim, P, patch_len)."""
    B, ws, V = x.shape
    assert ws % patch_len == 0, "ws must be a multiple of patch_len"
    P = ws // patch_len
    # encoder (a): non-overlapping patching (this tensor is a required output)
    patched = jnp.transpose(x, (0, 2, 1)).reshape(B, V, P, patch_len)
    # While the encoder transformer stack is identity, fold the shared patch
    # embedding into each per-variable head (exact algebra):
    #   (p @ w_emb + b_emb) @ w_head[v] + b_head[v]
    #     = p @ (w_emb @ w_head[v]) + (b_emb @ w_head[v] + b_head[v])
    w_eff = jnp.einsum("ld,vdk->vlk", params["w_emb"], params["w_head"])
    b_eff = jnp.einsum("d,vdk->vk", params["b_emb"], params["w_head"]) + params["b_head"]
    # (for large shapes: pass patched/w_eff/b_eff as bf16 with out_dtype=f32 to
    #  halve HBM traffic; kept f32 here so the correctness tolerance stays tight)
    out = fused_head(patched, w_eff, b_eff)
    return patched, out


def jepatchtrad_ref(params, x, patch_len):
    """Pure-JAX reference (unfolded: embed -> head), for correctness checking."""
    B, ws, V = x.shape
    P = ws // patch_len
    patched = jnp.transpose(x, (0, 2, 1)).reshape(B, V, P, patch_len)
    h = patched @ params["w_emb"] + params["b_emb"]
    out = jnp.einsum("bvpd,vdn->bvpn", h, params["w_head"]) \
        + params["b_head"][None, :, None, :]
    return patched, out


# ----------------------------------------------------------------------------
if __name__ == "__main__":
    # config: ws=64, patch_len=8 -> num_patches=8, in_dim=4, d_model=32
    B, ws, in_dim = 2, 64, 4
    patch_len, d_model = 8, 32

    key = jax.random.PRNGKey(0)
    k_x, k_p = jax.random.split(key)
    x = jax.random.normal(k_x, (B, ws, in_dim), jnp.float32)
    params = init_params(k_p, in_dim, patch_len, d_model)

    patched, out = jax.jit(
        lambda p, xx: jepatchtrad_forward(p, xx, patch_len)
    )(params, x)
    jax.block_until_ready((patched, out))

    patched_ref, out_ref = jepatchtrad_ref(params, x, patch_len)
    P = ws // patch_len
    assert patched.shape == (B, in_dim, P, patch_len)
    assert out.shape == (B, in_dim, P, patch_len)
    assert jnp.allclose(patched, patched_ref, atol=1e-4)
    assert jnp.allclose(out, out_ref, atol=1e-4)

    print("KERNEL_OK")
</pallas_src>

<mosaic_0001>
module attributes {stable_mosaic.version = 11 : i64} {
  func.func @_head_kernel(%arg0: i32, %arg1: i32, %arg2: memref<2x1x8x8xf32, #tpu.memory_space<vmem>>, %arg3: memref<1x8x8xf32, #tpu.memory_space<vmem>>, %arg4: memref<1x1x8xf32, #tpu.memory_space<vmem>>, %arg5: memref<2x1x8x8xf32, #tpu.memory_space<vmem>>) attributes {dimension_semantics = [#tpu.dimension_semantics<parallel>, #tpu.dimension_semantics<parallel>], iteration_bounds = array<i64: 4, 1>, scalar_prefetch = 0 : i64, scratch_operands = 0 : i64, tpu.core_type = #tpu.core_type<tc>, window_params = [{transform_indices = @transform_0, window_bounds = array<i64: 2, 1, 8, 8>}, {transform_indices = @transform_1, window_bounds = array<i64: 1, 8, 8>}, {transform_indices = @transform_2, window_bounds = array<i64: 1, 1, 8>}, {transform_indices = @transform_3, window_bounds = array<i64: 2, 1, 8, 8>}]} {
    %c0 = arith.constant 0 : index
    %c0_0 = arith.constant 0 : index
    %c0_1 = arith.constant 0 : index
    %0 = vector.load %arg3[%c0, %c0_0, %c0_1] : memref<1x8x8xf32, #tpu.memory_space<vmem>>, vector<1x8x8xf32>
    %1 = vector.shape_cast %0 : vector<1x8x8xf32> to vector<8x8xf32>
    %c0_2 = arith.constant 0 : index
    %c0_3 = arith.constant 0 : index
    %c0_4 = arith.constant 0 : index
    %2 = vector.load %arg4[%c0_2, %c0_3, %c0_4] : memref<1x1x8xf32, #tpu.memory_space<vmem>>, vector<1x1x8xf32>
    %3 = vector.shape_cast %2 : vector<1x1x8xf32> to vector<1x8xf32>
    %c0_5 = arith.constant 0 : index
    %c0_6 = arith.constant 0 : index
    %c0_7 = arith.constant 0 : index
    %c0_8 = arith.constant 0 : index
    %4 = vector.load %arg2[%c0_5, %c0_6, %c0_7, %c0_8] : memref<2x1x8x8xf32, #tpu.memory_space<vmem>>, vector<2x1x8x8xf32>
    %5 = vector.shape_cast %4 : vector<2x1x8x8xf32> to vector<2x8x8xf32>
    %6 = vector.shape_cast %5 : vector<2x8x8xf32> to vector<16x8xf32>
    %cst = arith.constant dense<0.000000e+00> : vector<16x8xf32>
    %7 = tpu.matmul %6, %1, %cst {dimension_numbers = #tpu.dot_dimension_numbers<[1], [0], [0], [1], [0, 0, 1, 1], [], []>} : vector<16x8xf32>, vector<8x8xf32>, vector<16x8xf32> -> vector<16x8xf32>
    %8 = vector.broadcast %3 : vector<1x8xf32> to vector<16x8xf32>
    %9 = arith.addf %7, %8 : vector<16x8xf32>
    %10 = vector.shape_cast %9 : vector<16x8xf32> to vector<2x8x8xf32>
    %c0_9 = arith.constant 0 : index
    %c0_10 = arith.constant 0 : index
    %c0_11 = arith.constant 0 : index
    %c0_12 = arith.constant 0 : index
    %11 = vector.load %arg5[%c0_9, %c0_10, %c0_11, %c0_12] : memref<2x1x8x8xf32, #tpu.memory_space<vmem>>, vector<2x1x8x8xf32>
    %12 = vector.shape_cast %11 : vector<2x1x8x8xf32> to vector<2x8x8xf32>
    %13 = vector.shape_cast %10 : vector<2x8x8xf32> to vector<2x1x8x8xf32>
    tpu.vector_store %arg5[%c0_9, %c0_10, %c0_11, %c0_12], %13 {strides = array<i32>} : memref<2x1x8x8xf32, #tpu.memory_space<vmem>>, vector<2x1x8x8xf32>,
    return
  }
  func.func @transform_0(%arg0: i32, %arg1: i32) -> (i32, i32, i32, i32) {
    %c0_i32 = arith.constant 0 : i32
    %c0_i32_0 = arith.constant 0 : i32
    %c0_i32_1 = arith.constant 0 : i32
    return %arg1, %arg0, %c0_i32, %c0_i32_0 : i32, i32, i32, i32
  }
  func.func @transform_1(%arg0: i32, %arg1: i32) -> (i32, i32, i32) {
    %c0_i32 = arith.constant 0 : i32
    %c0_i32_0 = arith.constant 0 : i32
    %c0_i32_1 = arith.constant 0 : i32
    return %arg0, %c0_i32, %c0_i32_0 : i32, i32, i32
  }
  func.func @transform_2(%arg0: i32, %arg1: i32) -> (i32, i32, i32) {
    %c0_i32 = arith.constant 0 : i32
    %c0_i32_0 = arith.constant 0 : i32
    %c0_i32_1 = arith.constant 0 : i32
    return %arg0, %c0_i32, %c0_i32_0 : i32, i32, i32
  }
  func.func @transform_3(%arg0: i32, %arg1: i32) -> (i32, i32, i32, i32) {
    %c0_i32 = arith.constant 0 : i32
    %c0_i32_0 = arith.constant 0 : i32
    %c0_i32_1 = arith.constant 0 : i32
    return %arg1, %arg0, %c0_i32, %c0_i32_0 : i32, i32, i32, i32
  }
}

</mosaic_0001>

<bundles_post_ra>
// kernel: _lambda_.1
= control target key start
LH: loop header
LB: loop body
LE: loop exit
PB: predicated region body
PF: predicated region fallthrough
CT: control target
= control target key end

     0   :  { %8 = vsyncpa [#allocation4], 0  ;;  %s708_s0 = inlined_call_operand.vmem [shape: f32[2,4,8,8], index: 0, kind: input, shape index: {}]   ;;  %s709_s1 = inlined_call_operand.vmem [shape: f32[4,8,8], index: 1, kind: input, shape index: {}]   ;;  %s710_s2 = inlined_call_operand.vmem [shape: f32[4,1,8], index: 2, kind: input, shape index: {}]   ;;  %s711_s3 = inlined_call_operand.hbm [shape: f32[2,4,8,8], index: 3, kind: output, shape index: {}]  }
   0x1   :  { %10 = vsyncpa [#allocation4 + $0x1], 0  ;;  %s597_s12 = smov 0   ;;  %s599_s13 = smov 0  }
   0x2   :  { %s601_s14 = smov 0   ;;  %s603_s15 = smov 0  }
   0x3   :  { %s605_s16 = smov 0   ;;  %s607_s17 = smov 0  }
   0x4 LB: > { %s418_s18 = sadd.s32 4294967295, %s572_s17   ;;  %s419_s19 = sadd.s32 4294967294, %s572_s17   ;;  %s572_s17 = sphi %s607_s17, %s16_s17   ;;  %s568_s16 = sphi %s605_s16, %s718_s16   ;;  %s564_s15 = sphi %s603_s15, %s717_s15   ;;  %s560_s14 = sphi %s601_s14, %s716_s14   ;;  %s556_s13 = sphi %s599_s13, %s715_s13   ;;  %s552_s12 = sphi %s597_s12, %s714_s12  }
   0x5   : > { %s28_s20 = sadd.s32 1, %s568_s16  ;;  %s37_s21 = sadd.s32 1, %s560_s14 }
   0x6   : > { %p30_p0 = scmp.ge.s32.totalorder %s28_s20, 4  ;;  %p44_p1 = scmp.ne.s32.totalorder %s560_s14, %s556_s13 }
   0x7   : > { %p45_p2 = scmp.eq.s32.totalorder %s572_s17, 0  ;;  %p128_p3 = scmp.eq.s32.totalorder %s418_s18, 3 }
   0x8   : > { %s720_s20 = smov (%p30_p0, %s28_s20), 0  ;;  %p133_p6 = scmp.ne.s32.totalorder %s556_s13, %s552_s12 }
   0x9   : > { %p46_p4 = por %p45_p2, %p44_p1  ;;  %p636_p5 = por %p128_p3, %p44_p1 }
   0xa   : > { %s33_s23 = ssub.s32 %s568_s16, %s720_s20  ;;  %p134_p8 = scmp.eq.s32.totalorder %s419_s19, 3 }
   0xb   : > { %p35_p7 = scmp.eq.s32.totalorder %s33_s23, 0  ;;  %p421_p10 = scmp.ge.s32.totalorder %s572_s17, 4 }
   0xc   : > { %p647_p9 = por %p134_p8, %p133_p6 }
   0xd   : > { %s645_s24 = scalar_select %p35_p7, %s560_s14, %s37_s21  }
   0xe   : > { %150 = sbr.rel (%p421_p10) target bundleno = 25 (0x19), region = 16 }
  0x13   : > { %153 = sbr.rel (!%p46_p4) target bundleno = 25 (0x19), region = 20  ;;  %s155_s26 = sand.u32 (%p46_p4), 1, %s560_s14  }
  0x14   : > { %s423_s27 = sshll.u32 (%p46_p4), %s568_s16, 3  ;;  %s422_s28 = sshll.u32 (%p46_p4), %s155_s26, 4 }
  0x15   : > { %s162_s4 = scalar_lea.vmem (%p46_p4), %s708_s0, %s423_s27  ;;  %s157_s5 = scalar_lea.vmem (%p46_p4), [#allocation2], %s422_s28 }
  0x16   : > { %v193_v0 = vld [vmem:[%s162_s4] sm:$0xff] (%p46_p4) }
  0x17   : > { %v195_v1 = vld [vmem:[%s162_s4 + $0x20] sm:$0xff] (%p46_p4)  ;;  %194 = vst [vmem:[%s157_s5] sm:$0xff] (%p46_p4), %v193_v0 }
  0x18   : > { %196 = vst [vmem:[%s157_s5 + $0x8] sm:$0xff] %v195_v1 }
  0x19 PF: > { %p424_p11 = scmp.ge.s32.totalorder %s572_s17, 1  ;;  %p214_p12 = scmp.lt.s32.totalorder %s572_s17, 5 }
  0x1b   : > { %p215_p13 = pnand %p424_p11, %p214_p12 }
  0x1c   : > { %p252_p0 = scmp.lt.s32.totalorder (!%p215_p13), %s564_s15, 3  ;;  %s221_s6 = sand.u32 (!%p215_p13), 1, %s556_s13  }
  0x1d   : > { %218 = sbr.rel (%p215_p13) target bundleno = 174 (0xae), region = 66  ;;  %s425_s7 = sshll.u32 (!%p215_p13), %s221_s6, 4 }
  0x1e   : > { %s223_s19 = scalar_lea.vmem (!%p215_p13), [#allocation2], %s425_s7  ;;  %s431_s27 = sshll.u32 (!%p215_p13), %s564_s15, 3 }
  0x1f   : > { %s313_s30 = scalar_lea.hbm (!%p215_p13), %s711_s3, %s431_s27  ;;  %s250_s4 = scalar_lea.vmem (!%p215_p13), [#allocation3], %s425_s7 }
  0x20   : > { %s314_s5 = sshll.u32 (!%p215_p13), %s250_s4, 4  ;;  %s315_s5 = int_to_ptr.vmem [resolvable:$true] %s314_s5 }
  0x22   : > { %s253_s8 = scalar_select %p252_p0, %s564_s15, 3  ;;  %v262_v2 = vld [vmem:[%s223_s19] sm:$0xff]  ;;  %vm267_vm0 = vcmask 64512   ;;  %v263_v3 = vld [vmem:[%s223_s19 + $0x8] sm:$0xff] }
  0x23   : > { %s300_s15 = scalar_lea.sflag [#allocation4], %s221_s6 }
  0x24   : > { %s427_s9 = sshll.u32 %s253_s8, 3  ;;  %s258_s26 = scalar_lea.vmem %s710_s2, %s253_s8 }
  0x25   : > { %s255_s18 = scalar_lea.vmem %s709_s1, %s427_s9  ;;  %v493_v5 = vld [vmem:[%s258_s26] ss:$0 sm:$0xff]  ;;  %s316_s9 = sshll.u32 %s313_s30, 4  ;;  %s317_s9 = int_to_ptr.hbm [resolvable:$true] %s316_s9 }
  0x26   : > { %v260_v4 = vld [vmem:[%s255_s18] sm:$0xff]  ;;  %s508_s8 = sshra.s32 %s317_s9, 4  ;;  %s514_s18 = scalar_lea.hbm %s711_s3, 64  ;;  %s509_s8 = int_to_ptr.hbm [resolvable:$true] %s508_s8 }
  0x27   : > { %289 = vmatpush.msra.mxu0 %v260_v4  ;;  %434 = vmatpush.msra.mxu1 %v260_v4  ;;  %s510_s10 = scalar_lea.hbm %s509_s8, 16  ;;  %p515_p4 = scmp.lt.s32.totalorder %s509_s8, %s711_s3 }
  0x28   : > { %428 = vmatmul.msk.f32.vlgmr.msra.gmra.mxu0 %vm267_vm0, %v262_v2  ;;  %429 = vmatmul.msk.f32.vlgmr.msra.gmra.mxu1 %vm267_vm0, %v263_v3  ;;  %p511_p1 = scmp.ne.s32.totalorder %s509_s8, %s510_s10  ;;  %p516_p6 = scmp.lt.s32.totalorder %s514_s18, %s510_s10 }
  0x2a   : > { %p512_p2 = pnand %p511_p1, %p636_p5  ;;  %p517_p7 = por %p516_p6, %p515_p4 }
  0x2c   : > { %p513_p3 = pneg %p512_p2 }
  0x2e   : > { %p518_p8 = pnand %p517_p7, %p513_p3 }
  0xa5   : > { %v291_v6 = vpop.f32.mrf.mxu0  ;;  %v294_v7 = vpop.f32.mrf.mxu1 }
  0xa6   : > { %v292_v8 = vadd.f32 %v493_v5, %v291_v6  ;;  %v295_v9 = vadd.f32 %v493_v5, %v294_v7 }
  0xa8   : > { %297 = vst.msk [vmem:[%s250_s4] sm:$0xff] %vm267_vm0, %v292_v8 }
  0xa9   : > { %298 = vst.msk [vmem:[%s250_s4 + $0x8] sm:$0xff] %vm267_vm0, %v295_v9 }
  0xaa   : > { %521 = shalt.err (!%p518_p8)
}
  0xab   : > { %s574_s6 = smov 128   ;;  %s575_s23 = smov 512  }
  0xac   : > { %s576_s26 = smov 8  }
  0xad   : > { %435 = dma.vmem_to_hbm [thread:$0]  (%p636_p5), %s315_s5, 256, %s317_s9, %s300_s15, %s574_s6, %s575_s23, %s576_s26  }
  0xae PF: > { %p441_p10 = scmp.ge.s32.totalorder %s572_s17, 2  ;;  %s331_s27 = sand.u32 1, %s552_s12  }
  0xaf   : > { %s332_s28 = scalar_lea.sflag [#allocation4], %s331_s27 }
  0xb0   : > { %p438_p11 = pnand %p441_p10, %p647_p9 }
  0xb2   : > { %p439_p12 = pneg %p438_p11 }
  0xb4   : > { %547 = dma.done.wait (%p439_p12), %s332_s28, 256  }
  0xb5   : > { %549 = vsyncadd (%p439_p12), %s332_s28, 4294967040  ;;  %s16_s17 = sadd.s32 1, %s572_s17   ;;  %s714_s12 = smov %s556_s13 }
  0xb6   : > { %p13_p13 = scmp.ge.s32.totalorder %s16_s17, 6   ;;  %s715_s13 = smov %s560_s14 }
  0xb7   : > { %s716_s14 = smov %s645_s24  ;;  %s717_s15 = smov %s568_s16 }
  0xb8   : > { %s718_s16 = smov %s720_s20  ;;  %15 = sbr.rel (!%p13_p13) target bundleno = 4 (0x4), region = 116 }
  0xbd   :  { %338 = vsyncpa [#allocation4], 1 }
  0xbe   :  { %340 = vsyncpa [#allocation4 + $0x1], 1 }

</bundles_post_ra>
